<compile_context>
chip_gen: v7x
topology: tpu7x:2x2x1
jax: 0.10.0
libtpu: 0.0.40
codegen_flags: <defaults>
</compile_context>

<pallas_src>
import functools

import jax
import jax.numpy as jnp
from jax.experimental import pallas as pl
from jax.experimental.pallas import tpu as pltpu

LANE = 128
SUBLANE = 8


def _round_up(x, m):
    return (x + m - 1) // m * m


def _ff_kernel(x_ref, w1_ref, b1_ref, w2_ref, b2_ref, o_ref, *, seq_len):
    x = x_ref[...]                       # (rows, Cin_p), native dtype (no up-cast)
    rows = x.shape[0]

    # Row position within its own sequence. Each block holds a whole number of
    # sequences, so these masks serve both conv layers and also zero the rows that
    # would otherwise leak across batch boundaries via the circular roll.
    t_idx = jax.lax.broadcasted_iota(jnp.int32, (rows, 1), 0) % seq_len
    not_first = t_idx != 0               # h[t-1] is the zero pad on the first row
    not_last = t_idx != (seq_len - 1)    # h[t+1] is the zero pad on the last row

    def conv3_relu(h, w_ref, b_ref):
        # y[t] = relu( h[t-1]@W0 + h[t]@W1 + h[t+1]@W2 + b ) as a single K=3*C matmul.
        h_m1 = jnp.where(not_first, pltpu.roll(h, shift=1, axis=0), 0)
        h_p1 = jnp.where(not_last, pltpu.roll(h, shift=rows - 1, axis=0), 0)
        hk = jnp.concatenate([h_m1, h, h_p1], axis=-1)          # (rows, 3*C)
        y = jnp.dot(hk, w_ref[...], preferred_element_type=jnp.float32)
        return jnp.maximum(y + b_ref[...], 0.0)                 # bias + ReLU on f32

    h1 = conv3_relu(x, w1_ref, b1_ref).astype(x.dtype)
    # TODO(synk): nn.Dropout is identity in eval mode; train-mode dropout omitted.
    h2 = conv3_relu(h1, w2_ref, b2_ref)
    o_ref[...] = h2.astype(o_ref.dtype)


def _target_rows(cin_p, cout_p, itemsize, vmem_budget_bytes=6 << 20):
    # Rough, conservative per-row VMEM working set (input tile, shifted copies, wide-K
    # operand, f32 accumulators, intermediate, output tile, double-buffer headroom).
    per_row = itemsize * (7 * cin_p + 8 * cout_p) + 8 * cout_p
    rows = vmem_budget_bytes // max(per_row, 1)
    rows = max(256, min(2048, rows))
    return (rows // SUBLANE) * SUBLANE


def _pick_batches_per_block(B, T, target_rows):
    # rows per grid step (bb*T) must be a multiple of 8 sublanes unless the block
    # spans the whole array. Prefer >=2 grid steps (megacore / dual-TC sharding),
    # then the largest block under the per-step row budget.
    cands = []
    for bb in range(1, B + 1):
        if B % bb:
            continue
        if bb != B and (bb * T) % SUBLANE != 0:
            continue
        cands.append(bb)
    multi = [bb for bb in cands if bb < B and bb * T <= target_rows]
    if multi:
        return max(multi)
    under = [bb for bb in cands if bb * T <= target_rows]
    if under:
        return max(under)
    return min(cands)


def positionwise_ff(x, w1, b1, w2, b2):
    """x: (B, T, Cin); w1: (3, Cin, Cout); w2: (3, Cout, Cout); b*: (1, Cout).

    wK[k, i, o] corresponds to PyTorch Conv1d weight[o, i, k] (weights pre-transposed).
    """
    B, T, Cin = x.shape
    Cout = w1.shape[2]
    assert w2.shape[1] == Cout, "conv2 input channels must equal conv1 output channels"
    cdt = x.dtype
    itemsize = jnp.dtype(cdt).itemsize

    # Lane-dense channel padding (zero-padded channels contribute exactly zero).
    Cin_p = _round_up(Cin, LANE)
    Cout_p = _round_up(Cout, LANE)

    x_p = jnp.pad(x, ((0, 0), (0, 0), (0, Cin_p - Cin))).reshape(B * T, Cin_p)
    w1_p = jnp.pad(w1, ((0, 0), (0, Cin_p - Cin), (0, Cout_p - Cout)))
    w2_p = jnp.pad(w2, ((0, 0), (0, Cout_p - Cout), (0, Cout_p - Cout)))
    # Row k*C + c of the fused weight <-> W[k, c, :], matching the [h_m1|h|h_p1] lanes.
    w1_f = w1_p.reshape(3 * Cin_p, Cout_p).astype(cdt)
    w2_f = w2_p.reshape(3 * Cout_p, Cout_p).astype(cdt)
    b1_p = jnp.pad(b1, ((0, 0), (0, Cout_p - Cout))).astype(jnp.float32)
    b2_p = jnp.pad(b2, ((0, 0), (0, Cout_p - Cout))).astype(jnp.float32)

    bb = _pick_batches_per_block(B, T, _target_rows(Cin_p, Cout_p, itemsize))
    rows_blk = bb * T
    grid = (B // bb,)

    flops = (2 * (B * T) * (3 * Cin_p) * Cout_p
             + 2 * (B * T) * (3 * Cout_p) * Cout_p)
    bytes_accessed = (x_p.size * itemsize + w1_f.size * itemsize + w2_f.size * itemsize
                      + b1_p.size * 4 + b2_p.size * 4 + B * T * Cout_p * itemsize)

    out2d = pl.pallas_call(
        functools.partial(_ff_kernel, seq_len=T),
        out_shape=jax.ShapeDtypeStruct((B * T, Cout_p), cdt),
        grid_spec=pltpu.PrefetchScalarGridSpec(
            num_scalar_prefetch=0,
            grid=grid,
            in_specs=[
                pl.BlockSpec((rows_blk, Cin_p), lambda i: (i, 0)),
                pl.BlockSpec((3 * Cin_p, Cout_p), lambda i: (0, 0)),   # resident
                pl.BlockSpec((1, Cout_p), lambda i: (0, 0)),
                pl.BlockSpec((3 * Cout_p, Cout_p), lambda i: (0, 0)),  # resident
                pl.BlockSpec((1, Cout_p), lambda i: (0, 0)),
            ],
            out_specs=pl.BlockSpec((rows_blk, Cout_p), lambda i: (i, 0)),
        ),
        compiler_params=pltpu.CompilerParams(
            dimension_semantics=("parallel",),
            vmem_limit_bytes=48 * 1024 * 1024,
        ),
        cost_estimate=pl.CostEstimate(
            flops=flops, transcendentals=0, bytes_accessed=bytes_accessed),
    )(x_p, w1_f, b1_p, w2_f, b2_p)

    return out2d.reshape(B, T, Cout_p)[:, :, :Cout]


def _reference(x, w1, b1, w2, b2):
    # Pure-JAX reference: shifted-matmul formulation of the (1,1)-zero-padded Conv1d(k=3).
    def conv3_same(h, w, b):
        zeros = jnp.zeros_like(h[:, :1, :])
        h_m1 = jnp.concatenate([zeros, h[:, :-1, :]], axis=1)
        h_p1 = jnp.concatenate([h[:, 1:, :], zeros], axis=1)
        y = (jnp.einsum("btc,cd->btd", h_m1, w[0])
             + jnp.einsum("btc,cd->btd", h, w[1])
             + jnp.einsum("btc,cd->btd", h_p1, w[2]))
        return y + b[0]

    h1 = jnp.maximum(conv3_same(x, w1, b1), 0.0)
    return jnp.maximum(conv3_same(h1, w2, b2), 0.0)


if __name__ == "__main__":
    B, T, D = 2, 8, 32  # dim_in == dim_out (required by the module's own forward)
    key = jax.random.PRNGKey(0)
    kx, kw1, kb1, kw2, kb2 = jax.random.split(key, 5)

    x = jax.random.normal(kx, (B, T, D), dtype=jnp.float32)
    # PyTorch Conv1d weight is (C_out, C_in, 3); stored pre-transposed as (3, C_in, C_out).
    w1 = jax.random.normal(kw1, (3, D, D), dtype=jnp.float32) * 0.1
    b1 = jax.random.normal(kb1, (1, D), dtype=jnp.float32) * 0.1
    w2 = jax.random.normal(kw2, (3, D, D), dtype=jnp.float32) * 0.1
    b2 = jax.random.normal(kb2, (1, D), dtype=jnp.float32) * 0.1

    ff = jax.jit(positionwise_ff)
    out = jax.block_until_ready(ff(x, w1, b1, w2, b2))

    ref = _reference(x, w1, b1, w2, b2)
    assert out.shape == (B, T, D)
    assert jnp.allclose(out, ref, atol=1e-4, rtol=1e-4), "mismatch vs reference"
    print("KERNEL_OK")
</pallas_src>

<mosaic_0001>
module attributes {stable_mosaic.version = 11 : i64} {
  func.func @_ff_kernel(%arg0: i32, %arg1: memref<8x128xf32, #tpu.memory_space<vmem>>, %arg2: memref<384x128xf32, #tpu.memory_space<vmem>>, %arg3: memref<1x128xf32, #tpu.memory_space<vmem>>, %arg4: memref<384x128xf32, #tpu.memory_space<vmem>>, %arg5: memref<1x128xf32, #tpu.memory_space<vmem>>, %arg6: memref<8x128xf32, #tpu.memory_space<vmem>>) attributes {dimension_semantics = [#tpu.dimension_semantics<parallel>], iteration_bounds = array<i64: 2>, scalar_prefetch = 0 : i64, scratch_operands = 0 : i64, tpu.core_type = #tpu.core_type<tc>, window_params = [{transform_indices = @transform_0, window_bounds = array<i64: 8, 128>}, {pipeline_mode = #tpu.pipeline_mode<synchronous>, transform_indices = @transform_1, window_bounds = array<i64: 384, 128>}, {pipeline_mode = #tpu.pipeline_mode<synchronous>, transform_indices = @transform_2, window_bounds = array<i64: 1, 128>}, {pipeline_mode = #tpu.pipeline_mode<synchronous>, transform_indices = @transform_3, window_bounds = array<i64: 384, 128>}, {pipeline_mode = #tpu.pipeline_mode<synchronous>, transform_indices = @transform_4, window_bounds = array<i64: 1, 128>}, {transform_indices = @transform_5, window_bounds = array<i64: 8, 128>}]} {
    %c0 = arith.constant 0 : index
    %c0_0 = arith.constant 0 : index
    %0 = vector.load %arg1[%c0, %c0_0] : memref<8x128xf32, #tpu.memory_space<vmem>>, vector<8x128xf32>
    %1 = tpu.iota {dimensions = array<i32: 0>} : vector<8x1xi32>
    %c8_i32 = arith.constant 8 : i32
    %c0_i32 = arith.constant 0 : i32
    %2 = arith.cmpi eq, %c8_i32, %c0_i32 : i32
    %c1_i32 = arith.constant 1 : i32
    %3 = arith.select %2, %c1_i32, %c8_i32 : i32
    %4 = vector.broadcast %3 : i32 to vector<8x1xi32>
    %5 = arith.remsi %1, %4 : vector<8x1xi32>
    %c0_i32_1 = arith.constant 0 : i32
    %6 = vector.broadcast %c0_i32_1 : i32 to vector<8x1xi32>
    %7 = arith.cmpi ne, %5, %6 : vector<8x1xi32>
    %c0_i32_2 = arith.constant 0 : i32
    %8 = vector.broadcast %c0_i32_2 : i32 to vector<8x1xi32>
    %9 = arith.cmpi slt, %5, %8 : vector<8x1xi32>
    %c0_i32_3 = arith.constant 0 : i32
    %10 = arith.cmpi slt, %3, %c0_i32_3 : i32
    %11 = vector.broadcast %10 : i1 to vector<8x1xi1>
    %12 = vector.broadcast %11 : vector<8x1xi1> to vector<8x1xi1>
    %13 = arith.xori %9, %12 : vector<8x1xi1>
    %14 = arith.andi %13, %7 : vector<8x1xi1>
    %15 = vector.broadcast %3 : i32 to vector<8x1xi32>
    %16 = arith.addi %5, %15 : vector<8x1xi32>
    %17 = arith.select %14, %16, %5 : vector<8x1xi1>, vector<8x1xi32>
    %c0_i32_4 = arith.constant 0 : i32
    %18 = vector.broadcast %c0_i32_4 : i32 to vector<8x1xi32>
    %19 = arith.cmpi ne, %17, %18 : vector<8x1xi32>
    %c7_i32 = arith.constant 7 : i32
    %20 = vector.broadcast %c7_i32 : i32 to vector<8x1xi32>
    %21 = arith.cmpi ne, %17, %20 : vector<8x1xi32>
    %c1_i32_5 = arith.constant 1 : i32
    %22 = tpu.dynamic_rotate %0 by %c1_i32_5 dim 0 : vector<8x128xf32>, i32 -> vector<8x128xf32>
    %c0_i32_6 = arith.constant 0 : i32
    %23 = arith.sitofp %c0_i32_6 : i32 to f32
    %24 = vector.shape_cast %19 : vector<8x1xi1> to vector<8x1xi1>
    %25 = vector.broadcast %24 : vector<8x1xi1> to vector<8x128xi1>
    %26 = vector.broadcast %23 : f32 to vector<8x128xf32>
    %27 = arith.select %25, %22, %26 : vector<8x128xi1>, vector<8x128xf32>
    %c7_i32_7 = arith.constant 7 : i32
    %28 = tpu.dynamic_rotate %0 by %c7_i32_7 dim 0 : vector<8x128xf32>, i32 -> vector<8x128xf32>
    %c0_i32_8 = arith.constant 0 : i32
    %29 = arith.sitofp %c0_i32_8 : i32 to f32
    %30 = vector.shape_cast %21 : vector<8x1xi1> to vector<8x1xi1>
    %31 = vector.broadcast %30 : vector<8x1xi1> to vector<8x128xi1>
    %32 = vector.broadcast %29 : f32 to vector<8x128xf32>
    %33 = arith.select %31, %28, %32 : vector<8x128xi1>, vector<8x128xf32>
    %34 = tpu.concatenate %27, %0, %33 in 1 : vector<8x128xf32>, vector<8x128xf32>, vector<8x128xf32> -> vector<8x384xf32>
    %c0_9 = arith.constant 0 : index
    %c0_10 = arith.constant 0 : index
    %35 = vector.load %arg2[%c0_9, %c0_10] : memref<384x128xf32, #tpu.memory_space<vmem>>, vector<384x128xf32>
    %cst = arith.constant dense<0.000000e+00> : vector<8x128xf32>
    %36 = tpu.matmul %34, %35, %cst {dimension_numbers = #tpu.dot_dimension_numbers<[1], [0], [0], [1], [0, 0, 1, 1], [], []>} : vector<8x384xf32>, vector<384x128xf32>, vector<8x128xf32> -> vector<8x128xf32>
    %c0_11 = arith.constant 0 : index
    %c0_12 = arith.constant 0 : index
    %37 = vector.load %arg3[%c0_11, %c0_12] : memref<1x128xf32, #tpu.memory_space<vmem>>, vector<1x128xf32>
    %38 = vector.broadcast %37 : vector<1x128xf32> to vector<8x128xf32>
    %39 = arith.addf %36, %38 : vector<8x128xf32>
    %cst_13 = arith.constant 0.000000e+00 : f32
    %40 = vector.broadcast %cst_13 : f32 to vector<8x128xf32>
    %41 = arith.maximumf %39, %40 : vector<8x128xf32>
    %c1_i32_14 = arith.constant 1 : i32
    %42 = tpu.dynamic_rotate %41 by %c1_i32_14 dim 0 : vector<8x128xf32>, i32 -> vector<8x128xf32>
    %c0_i32_15 = arith.constant 0 : i32
    %43 = arith.sitofp %c0_i32_15 : i32 to f32
    %44 = vector.shape_cast %19 : vector<8x1xi1> to vector<8x1xi1>
    %45 = vector.broadcast %44 : vector<8x1xi1> to vector<8x128xi1>
    %46 = vector.broadcast %43 : f32 to vector<8x128xf32>
    %47 = arith.select %45, %42, %46 : vector<8x128xi1>, vector<8x128xf32>
    %c7_i32_16 = arith.constant 7 : i32
    %48 = tpu.dynamic_rotate %41 by %c7_i32_16 dim 0 : vector<8x128xf32>, i32 -> vector<8x128xf32>
    %c0_i32_17 = arith.constant 0 : i32
    %49 = arith.sitofp %c0_i32_17 : i32 to f32
    %50 = vector.shape_cast %21 : vector<8x1xi1> to vector<8x1xi1>
    %51 = vector.broadcast %50 : vector<8x1xi1> to vector<8x128xi1>
    %52 = vector.broadcast %49 : f32 to vector<8x128xf32>
    %53 = arith.select %51, %48, %52 : vector<8x128xi1>, vector<8x128xf32>
    %54 = tpu.concatenate %47, %41, %53 in 1 : vector<8x128xf32>, vector<8x128xf32>, vector<8x128xf32> -> vector<8x384xf32>
    %c0_18 = arith.constant 0 : index
    %c0_19 = arith.constant 0 : index
    %55 = vector.load %arg4[%c0_18, %c0_19] : memref<384x128xf32, #tpu.memory_space<vmem>>, vector<384x128xf32>
    %cst_20 = arith.constant dense<0.000000e+00> : vector<8x128xf32>
    %56 = tpu.matmul %54, %55, %cst_20 {dimension_numbers = #tpu.dot_dimension_numbers<[1], [0], [0], [1], [0, 0, 1, 1], [], []>} : vector<8x384xf32>, vector<384x128xf32>, vector<8x128xf32> -> vector<8x128xf32>
    %c0_21 = arith.constant 0 : index
    %c0_22 = arith.constant 0 : index
    %57 = vector.load %arg5[%c0_21, %c0_22] : memref<1x128xf32, #tpu.memory_space<vmem>>, vector<1x128xf32>
    %58 = vector.broadcast %57 : vector<1x128xf32> to vector<8x128xf32>
    %59 = arith.addf %56, %58 : vector<8x128xf32>
    %cst_23 = arith.constant 0.000000e+00 : f32
    %60 = vector.broadcast %cst_23 : f32 to vector<8x128xf32>
    %61 = arith.maximumf %59, %60 : vector<8x128xf32>
    %c0_24 = arith.constant 0 : index
    %c0_25 = arith.constant 0 : index
    %62 = vector.load %arg6[%c0_24, %c0_25] : memref<8x128xf32, #tpu.memory_space<vmem>>, vector<8x128xf32>
    tpu.vector_store %arg6[%c0_24, %c0_25], %61 {strides = array<i32>} : memref<8x128xf32, #tpu.memory_space<vmem>>, vector<8x128xf32>,
    return
  }
  func.func @transform_0(%arg0: i32) -> (i32, i32) {
    %c0_i32 = arith.constant 0 : i32
    %c0_i32_0 = arith.constant 0 : i32
    return %arg0, %c0_i32 : i32, i32
  }
  func.func @transform_1(%arg0: i32) -> (i32, i32) {
    %c0_i32 = arith.constant 0 : i32
    %c0_i32_0 = arith.constant 0 : i32
    %c0_i32_1 = arith.constant 0 : i32
    return %c0_i32, %c0_i32_0 : i32, i32
  }
  func.func @transform_2(%arg0: i32) -> (i32, i32) {
    %c0_i32 = arith.constant 0 : i32
    %c0_i32_0 = arith.constant 0 : i32
    %c0_i32_1 = arith.constant 0 : i32
    return %c0_i32, %c0_i32_0 : i32, i32
  }
  func.func @transform_3(%arg0: i32) -> (i32, i32) {
    %c0_i32 = arith.constant 0 : i32
    %c0_i32_0 = arith.constant 0 : i32
    %c0_i32_1 = arith.constant 0 : i32
    return %c0_i32, %c0_i32_0 : i32, i32
  }
  func.func @transform_4(%arg0: i32) -> (i32, i32) {
    %c0_i32 = arith.constant 0 : i32
    %c0_i32_0 = arith.constant 0 : i32
    %c0_i32_1 = arith.constant 0 : i32
    return %c0_i32, %c0_i32_0 : i32, i32
  }
  func.func @transform_5(%arg0: i32) -> (i32, i32) {
    %c0_i32 = arith.constant 0 : i32
    %c0_i32_0 = arith.constant 0 : i32
    return %arg0, %c0_i32 : i32, i32
  }
}

</mosaic_0001>

<bundles_post_ra>
// kernel: positionwise_ff.1
= control target key start
LH: loop header
LB: loop body
LE: loop exit
PB: predicated region body
PF: predicated region fallthrough
CT: control target
= control target key end

     0   :  { %10 = vsyncpa [#allocation3], 0  ;;  %s1594_s0 = inlined_call_operand.vmem [shape: f32[16,128], index: 0, kind: input, shape index: {}]   ;;  %s1595_s1 = inlined_call_operand.vmem [shape: f32[384,128], index: 1, kind: input, shape index: {}]   ;;  %s1596_s2 = inlined_call_operand.vmem [shape: f32[1,128], index: 2, kind: input, shape index: {}]   ;;  %s1597_s3 = inlined_call_operand.vmem [shape: f32[384,128], index: 3, kind: input, shape index: {}]   ;;  %s1598_s4 = inlined_call_operand.vmem [shape: f32[1,128], index: 4, kind: input, shape index: {}]   ;;  %s1599_s5 = inlined_call_operand.hbm [shape: f32[16,128], index: 5, kind: output, shape index: {}]  }
   0x1   :  { %12 = vsyncpa [#allocation3 + $0x1], 0  ;;  %s1157_s18 = smov 0   ;;  %s1159_s19 = smov 0  }
   0x2   :  { %s1161_s20 = smov 0   ;;  %s1163_s21 = smov 0  }
   0x3 LB: > { %s1178_s22 = sadd.s32 4294967295, %s1121_s21   ;;  %s715_s23 = sadd.s32 4294967294, %s1121_s21   ;;  %s1121_s21 = sphi %s1163_s21, %s1609_s21   ;;  %s1117_s20 = sphi %s1161_s20, %s1608_s20   ;;  %s1113_s19 = sphi %s1159_s19, %s1607_s19   ;;  %s1109_s18 = sphi %s1157_s18, %s1606_s18  }
   0x4   : > { %s1182_s24 = sadd.s32 1, %s1121_s21   ;;  %s135_s25 = sadd.s32 1, %s1117_s20 }
   0x5   : > { %s132_s26 = ssub.s32 %s1121_s21, %s1182_s24  ;;  %p145_p0 = scmp.ne.s32.totalorder %s1117_s20, %s1113_s19 }
   0x6   : > { %p133_p1 = scmp.eq.s32.totalorder %s132_s26, 0  ;;  %p146_p2 = scmp.eq.s32.totalorder %s1178_s22, 1 }
   0x7   : > { %p151_p3 = scmp.ne.s32.totalorder %s1113_s19, %s1109_s18  ;;  %p152_p4 = scmp.eq.s32.totalorder %s715_s23, 1 }
   0x8   : > { %s1193_s27 = scalar_select %p133_p1, %s1117_s20, %s135_s25  }
   0x9   : > { %p1195_p5 = por %p146_p2, %p145_p0  ;;  %p1199_p6 = por %p152_p4, %p151_p3 }
   0xa   : > { %p718_p7 = scmp.ge.s32.totalorder %s1121_s21, 1  ;;  %p189_p8 = scmp.lt.s32.totalorder %s1121_s21, 3 }
   0xc   : > { %p190_p9 = pnand %p718_p7, %p189_p8 }
   0xd   : > { %v261_v0 = vld [vmem:[%s1595_s1 + $0x80] sm:$0xff] (!%p190_p9)  ;;  %v262_v1 = vld [vmem:[%s1595_s1 + $0x88] sm:$0xff] (!%p190_p9)  ;;  %v263_v5 = vld [vmem:[%s1595_s1 + $0x90] sm:$0xff] (!%p190_p9)  ;;  %v1123_v7 = vmov (!%p190_p9), 0.0|0.0   ;;  %p216_p10 = scmp.lt.s32.totalorder (!%p190_p9), %s1178_s22, 1  ;;  %vm1124_vm0 = vmmov (!%p190_p9), 0   ;;  %v221_v58 = vlaneseq (!%p190_p9) }
   0xe   : > { %193 = sbr.rel (%p190_p9) target bundleno = 506 (0x1fa), region = 40  ;;  %v245_v2 = vld [vmem:[%s1595_s1] sm:$0xff] (!%p190_p9)  ;;  %v905_v3 = vpack.c.bf16 (!%p190_p9), %v262_v1, %v261_v0  ;;  %v246_v4 = vld [vmem:[%s1595_s1 + $0x8] sm:$0xff] (!%p190_p9)  ;;  %v264_v6 = vld [vmem:[%s1595_s1 + $0x98] sm:$0xff] (!%p190_p9)  ;;  %937 = vmatprep.subr.bf16.mxu1 (!%p190_p9), %v1123_v7  ;;  %v1125_v13 = vmov (!%p190_p9), 0.0   ;;  %s213_s12 = sand.u32 (!%p190_p9), 1, %s1113_s19  }
   0xf   : > { %v907_v8 = vpack.c.bf16 (!%p190_p9), %v246_v4, %v245_v2  ;;  %v909_v9 = vpack.c.bf16 (!%p190_p9), %v264_v6, %v263_v5  ;;  %v247_v10 = vld [vmem:[%s1595_s1 + $0x10] sm:$0xff] (!%p190_p9)  ;;  %v248_v11 = vld [vmem:[%s1595_s1 + $0x18] sm:$0xff] (!%p190_p9)  ;;  %v277_v12 = vld [vmem:[%s1595_s1 + $0x100] sm:$0xff] (!%p190_p9)  ;;  %867 = vmatprep.mubr.msk.f32.mxu1 (!%p190_p9), %vm1124_vm0, %v1125_v13  ;;  %v222_v4 = vshrl.u32 (!%p190_p9), %v221_v58, 7  ;;  %s719_s14 = sshll.u32 (!%p190_p9), %s213_s12, 3 }
  0x10   : > { %906 = vmatprep.subr.bf16.mxu0 (!%p190_p9), %v905_v3  ;;  %v278_v14 = vld [vmem:[%s1595_s1 + $0x108] sm:$0xff] (!%p190_p9)  ;;  %v265_v15 = vld [vmem:[%s1595_s1 + $0xa0] sm:$0xff] (!%p190_p9)  ;;  %v911_v17 = vpack.c.bf16 (!%p190_p9), %v248_v11, %v247_v10  ;;  %v279_v19 = vld [vmem:[%s1595_s1 + $0x110] sm:$0xff] (!%p190_p9)  ;;  %s215_s17 = scalar_lea.vmem (!%p190_p9), [#allocation2], %s719_s14 }
  0x11   : > { %v266_v16 = vld [vmem:[%s1595_s1 + $0xa8] sm:$0xff] (!%p190_p9)  ;;  %908 = vmatpush3.bf16.msra.mxu0 (!%p190_p9), %v907_v8  ;;  %v938_v18 = vpack.c.bf16 (!%p190_p9), %v278_v14, %v277_v12  ;;  %v249_v21 = vld [vmem:[%s1595_s1 + $0x20] sm:$0xff] (!%p190_p9)  ;;  %v280_v23 = vld [vmem:[%s1595_s1 + $0x118] sm:$0xff] (!%p190_p9)  ;;  %s656_s25 = sshll.u32 (!%p190_p9), %s215_s17, 4  ;;  %s1554_s25 = int_to_ptr.vmem [resolvable:$true] %s656_s25 }
  0x12   : > { %910 = vmatprep.subr.bf16.mxu0 (!%p190_p9), %v909_v9  ;;  %v913_v20 = vpack.c.bf16 (!%p190_p9), %v266_v16, %v265_v15  ;;  %v250_v22 = vld [vmem:[%s1595_s1 + $0x28] sm:$0xff] (!%p190_p9)  ;;  %v941_v24 = vpack.c.bf16 (!%p190_p9), %v280_v23, %v279_v19  ;;  %v267_v25 = vld [vmem:[%s1595_s1 + $0xb0] sm:$0xff] (!%p190_p9)  ;;  %v268_v26 = vld [vmem:[%s1595_s1 + $0xb8] sm:$0xff] (!%p190_p9)  ;;  %v227_v16 = vand.u32 (!%p190_p9), 7, %v222_v4  ;;  %s1059_s8 = scalar_lea.vmem (!%p190_p9), %s1554_s25, 128 }
  0x13   : > { %939 = vmatpush3.bf16.msra.mxu1 (!%p190_p9), %v938_v18  ;;  %v281_v27 = vld [vmem:[%s1595_s1 + $0x120] sm:$0xff] (!%p190_p9)  ;;  %v282_v28 = vld [vmem:[%s1595_s1 + $0x128] sm:$0xff] (!%p190_p9)  ;;  %v915_v29 = vpack.c.bf16 (!%p190_p9), %v250_v22, %v249_v21  ;;  %v917_v30 = vpack.c.bf16 (!%p190_p9), %v268_v26, %v267_v25  ;;  %v251_v31 = vld [vmem:[%s1595_s1 + $0x30] sm:$0xff] (!%p190_p9)  ;;  %p1060_p11 = scmp.ne.s32.totalorder (!%p190_p9), %s1554_s25, %s1059_s8 }
  0x14   : > { %940 = vmatprep.subr.bf16.mxu1 (!%p190_p9), %v1123_v7  ;;  %v252_v32 = vld [vmem:[%s1595_s1 + $0x38] sm:$0xff] (!%p190_p9)  ;;  %v944_v33 = vpack.c.bf16 (!%p190_p9), %v282_v28, %v281_v27  ;;  %v269_v34 = vld [vmem:[%s1595_s1 + $0xc0] sm:$0xff] (!%p190_p9)  ;;  %v270_v35 = vld [vmem:[%s1595_s1 + $0xc8] sm:$0xff] (!%p190_p9)  ;;  %vm1394_vm1 = vcmp.ne.s32.totalorder (!%p190_p9), %v227_v16, 0  ;;  %vm1405_vm2 = vcmp.ne.s32.totalorder (!%p190_p9), %v227_v16, 7 }
  0x15   : > { %s217_s30 = scalar_select %p216_p10, %s1178_s22, 1  ;;  %912 = vmatpush3.bf16.msra.mxu0 %v911_v17  ;;  %v283_v36 = vld [vmem:[%s1595_s1 + $0x130] sm:$0xff]  ;;  %v284_v37 = vld [vmem:[%s1595_s1 + $0x138] sm:$0xff]  ;;  %v919_v38 = vpack.c.bf16 %v252_v32, %v251_v31  ;;  %v921_v39 = vpack.c.bf16 %v270_v35, %v269_v34  ;;  %v253_v40 = vld [vmem:[%s1595_s1 + $0x40] sm:$0xff] }
  0x16   : > { %914 = vmatprep.subr.bf16.mxu0 %v913_v20  ;;  %v254_v41 = vld [vmem:[%s1595_s1 + $0x48] sm:$0xff]  ;;  %v947_v42 = vpack.c.bf16 %v284_v37, %v283_v36  ;;  %v271_v43 = vld [vmem:[%s1595_s1 + $0xd0] sm:$0xff]  ;;  %v272_v44 = vld [vmem:[%s1595_s1 + $0xd8] sm:$0xff]  ;;  %p1061_p12 = pnand %p1060_p11, %p1195_p5 }
  0x17   : > { %s720_s23 = sshll.u32 %s217_s30, 3  ;;  %942 = vmatpush3.bf16.msra.mxu1 %v941_v24  ;;  %v285_v45 = vld [vmem:[%s1595_s1 + $0x140] sm:$0xff]  ;;  %v286_v46 = vld [vmem:[%s1595_s1 + $0x148] sm:$0xff]  ;;  %v923_v48 = vpack.c.bf16 %v254_v41, %v253_v40  ;;  %v925_v49 = vpack.c.bf16 %v272_v44, %v271_v43  ;;  %v255_v50 = vld [vmem:[%s1595_s1 + $0x50] sm:$0xff] }
  0x18   : > { %943 = vmatprep.subr.bf16.mxu1 %v1123_v7  ;;  %s219_s13 = scalar_lea.vmem %s1594_s0, %s720_s23  ;;  %v256_v51 = vld [vmem:[%s1595_s1 + $0x58] sm:$0xff]  ;;  %v950_v52 = vpack.c.bf16 %v286_v46, %v285_v45  ;;  %v273_v53 = vld [vmem:[%s1595_s1 + $0xe0] sm:$0xff]  ;;  %v274_v54 = vld [vmem:[%s1595_s1 + $0xe8] sm:$0xff]  ;;  %s643_s23 = scalar_lea.sflag [#allocation3], %s213_s12 }
  0x19   : > { %916 = vmatpush3.bf16.msra.mxu0 %v915_v29  ;;  %v1314_v47 = vld [vmem:[%s219_s13] sm:$0xff]  ;;  %v287_v55 = vld [vmem:[%s1595_s1 + $0x150] sm:$0xff]  ;;  %v288_v56 = vld [vmem:[%s1595_s1 + $0x158] sm:$0xff]  ;;  %v927_v57 = vpack.c.bf16 %v256_v51, %v255_v50  ;;  %v929_v59 = vpack.c.bf16 %v274_v54, %v273_v53  ;;  %s728_s13 = sshll.u32 %s1178_s22, 7  ;;  %p1062_p13 = pneg %p1061_p12 }
  0x1a   : > { %918 = vmatprep.subr.bf16.mxu0 %v917_v30  ;;  %364 = vmatprep.mubr.f32.mxu0 %v1314_v47  ;;  %v257_v60 = vld [vmem:[%s1595_s1 + $0x60] sm:$0xff]  ;;  %v258_v61 = vld [vmem:[%s1595_s1 + $0x68] sm:$0xff]  ;;  %v953_v62 = vpack.c.bf16 %v288_v56, %v287_v55  ;;  %v275_v63 = vld [vmem:[%s1595_s1 + $0xf0] sm:$0xff]  ;;  %v237_v23 = vrot.slane %v1314_v47, 7  ;;  %v241_v28 = vrot.slane %v1314_v47, 1  ;;  %s1552_s7 = scalar_lea.hbm %s1599_s5, %s728_s13  ;;  %s1126_s22 = smov [#allocation2]  }
  0x1b   : > { %945 = vmatpush3.bf16.msra.mxu1 %v944_v33  ;;  %v276_v0 = vld [vmem:[%s1595_s1 + $0xf8] sm:$0xff]  ;;  %v289_v1 = vld [vmem:[%s1595_s1 + $0x160] sm:$0xff]  ;;  %v290_v2 = vld [vmem:[%s1595_s1 + $0x168] sm:$0xff]  ;;  %v931_v3 = vpack.c.bf16 %v258_v61, %v257_v60  ;;  %s1063_s9 = sshll.u32 %s1126_s22, 4  ;;  %s1064_s9 = int_to_ptr.vmem [resolvable:$false] %s1063_s9 }
  0x1c   : > { %946 = vmatprep.subr.bf16.mxu1 %v1123_v7  ;;  %v933_v5 = vpack.c.bf16 %v276_v0, %v275_v63  ;;  %v259_v6 = vld [vmem:[%s1595_s1 + $0x70] sm:$0xff]  ;;  %v260_v8 = vld [vmem:[%s1595_s1 + $0x78] sm:$0xff]  ;;  %v956_v9 = vpack.c.bf16 %v290_v2, %v289_v1  ;;  %v461_v10 = vld [vmem:[%s1597_s3 + $0x80] sm:$0xff]  ;;  %s1065_s10 = scalar_lea.vmem %s1064_s9, 256  ;;  %p1066_p0 = scmp.lt.s32.totalorder %s1554_s25, %s1064_s9 }
  0x1d   : > { %920 = vmatpush3.bf16.msra.mxu0 %v919_v38  ;;  %v462_v11 = vld [vmem:[%s1597_s3 + $0x88] sm:$0xff]  ;;  %v291_v12 = vld [vmem:[%s1595_s1 + $0x170] sm:$0xff]  ;;  %v292_v14 = vld [vmem:[%s1595_s1 + $0x178] sm:$0xff]  ;;  %v935_v15 = vpack.c.bf16 %v260_v8, %v259_v6  ;;  %p1067_p1 = scmp.lt.s32.totalorder %s1065_s10, %s1059_s8 }
  0x1e   : > { %922 = vmatprep.subr.bf16.mxu0 %v921_v39  ;;  %v961_v17 = vpack.c.bf16 %v462_v11, %v461_v10  ;;  %v445_v18 = vld [vmem:[%s1597_s3] sm:$0xff]  ;;  %v446_v19 = vld [vmem:[%s1597_s3 + $0x8] sm:$0xff]  ;;  %v959_v20 = vpack.c.bf16 %v292_v14, %v291_v12  ;;  %v463_v21 = vld [vmem:[%s1597_s3 + $0x90] sm:$0xff] }
  0x1f   : > { %948 = vmatpush3.bf16.msra.mxu1 %v947_v42  ;;  %v464_v22 = vld [vmem:[%s1597_s3 + $0x98] sm:$0xff]  ;;  %v477_v24 = vld [vmem:[%s1597_s3 + $0x100] sm:$0xff]  ;;  %v478_v25 = vld [vmem:[%s1597_s3 + $0x108] sm:$0xff]  ;;  %v963_v27 = vpack.c.bf16 %v446_v19, %v445_v18  ;;  %p1068_p2 = por %p1067_p1, %p1066_p0 }
  0x20   : > { %949 = vmatprep.subr.bf16.mxu1 %v1123_v7  ;;  %v965_v29 = vpack.c.bf16 %v464_v22, %v463_v21  ;;  %v447_v30 = vld [vmem:[%s1597_s3 + $0x10] sm:$0xff]  ;;  %v448_v31 = vld [vmem:[%s1597_s3 + $0x18] sm:$0xff]  ;;  %v994_v33 = vpack.c.bf16 %v478_v25, %v477_v24  ;;  %v465_v34 = vld [vmem:[%s1597_s3 + $0xa0] sm:$0xff] }
  0x21   : > { %924 = vmatpush3.bf16.msra.mxu0 %v923_v48  ;;  %v466_v35 = vld [vmem:[%s1597_s3 + $0xa8] sm:$0xff]  ;;  %v479_v36 = vld [vmem:[%s1597_s3 + $0x110] sm:$0xff]  ;;  %v480_v37 = vld [vmem:[%s1597_s3 + $0x118] sm:$0xff]  ;;  %v967_v38 = vpack.c.bf16 %v448_v31, %v447_v30  ;;  %p1069_p3 = pnand %p1068_p2, %p1062_p13 }
  0x22   : > { %926 = vmatprep.subr.bf16.mxu0 %v925_v49  ;;  %v969_v39 = vpack.c.bf16 %v466_v35, %v465_v34  ;;  %v449_v40 = vld [vmem:[%s1597_s3 + $0x20] sm:$0xff]  ;;  %v450_v41 = vld [vmem:[%s1597_s3 + $0x28] sm:$0xff]  ;;  %v997_v42 = vpack.c.bf16 %v480_v37, %v479_v36  ;;  %v467_v43 = vld [vmem:[%s1597_s3 + $0xb0] sm:$0xff] }
  0x23   : > { %951 = vmatpush3.bf16.msra.mxu1 %v950_v52  ;;  %v468_v44 = vld [vmem:[%s1597_s3 + $0xb8] sm:$0xff]  ;;  %v481_v45 = vld [vmem:[%s1597_s3 + $0x120] sm:$0xff]  ;;  %v482_v46 = vld [vmem:[%s1597_s3 + $0x128] sm:$0xff]  ;;  %v971_v47 = vpack.c.bf16 %v450_v41, %v449_v40 }
  0x24   : > { %952 = vmatprep.subr.bf16.mxu1 %v1123_v7  ;;  %v973_v48 = vpack.c.bf16 %v468_v44, %v467_v43  ;;  %v451_v49 = vld [vmem:[%s1597_s3 + $0x30] sm:$0xff]  ;;  %v1000_v50 = vpack.c.bf16 %v482_v46, %v481_v45  ;;  %v469_v51 = vld [vmem:[%s1597_s3 + $0xc0] sm:$0xff]  ;;  %v470_v52 = vld [vmem:[%s1597_s3 + $0xc8] sm:$0xff] }
  0x25   : > { %928 = vmatpush3.bf16.msra.mxu0 %v927_v57  ;;  %v483_v53 = vld [vmem:[%s1597_s3 + $0x130] sm:$0xff]  ;;  %v484_v54 = vld [vmem:[%s1597_s3 + $0x138] sm:$0xff]  ;;  %v977_v56 = vpack.c.bf16 %v470_v52, %v469_v51  ;;  %v453_v57 = vld [vmem:[%s1597_s3 + $0x40] sm:$0xff] }
  0x26   : > { %930 = vmatprep.subr.bf16.mxu0 %v929_v59  ;;  %v454_v58 = vld [vmem:[%s1597_s3 + $0x48] sm:$0xff]  ;;  %v1003_v59 = vpack.c.bf16 %v484_v54, %v483_v53  ;;  %v485_v60 = vld [vmem:[%s1597_s3 + $0x140] sm:$0xff]  ;;  %v471_v0 = vld [vmem:[%s1597_s3 + $0xd0] sm:$0xff] }
  0x27   : > { %954 = vmatpush3.bf16.msra.mxu1 %v953_v62  ;;  %v486_v61 = vld [vmem:[%s1597_s3 + $0x148] sm:$0xff]  ;;  %v979_v62 = vpack.c.bf16 %v454_v58, %v453_v57  ;;  %v472_v1 = vld [vmem:[%s1597_s3 + $0xd8] sm:$0xff]  ;;  %v473_v10 = vld [vmem:[%s1597_s3 + $0xe0] sm:$0xff] }
  0x28   : > { %955 = vmatprep.subr.bf16.mxu1 %v1123_v7  ;;  %v1006_v63 = vpack.c.bf16 %v486_v61, %v485_v60  ;;  %v981_v2 = vpack.c.bf16 %v472_v1, %v471_v0  ;;  %v456_v4 = vld [vmem:[%s1597_s3 + $0x58] sm:$0xff]  ;;  %v474_v11 = vld [vmem:[%s1597_s3 + $0xe8] sm:$0xff]  ;;  %v457_v14 = vld [vmem:[%s1597_s3 + $0x60] sm:$0xff] }
  0x29   : > { %932 = vmatpush3.bf16.msra.mxu0 %v931_v3  ;;  %v455_v3 = vld [vmem:[%s1597_s3 + $0x50] sm:$0xff]  ;;  %v488_v8 = vld [vmem:[%s1597_s3 + $0x158] sm:$0xff]  ;;  %v985_v12 = vpack.c.bf16 %v474_v11, %v473_v10  ;;  %v490_v18 = vld [vmem:[%s1597_s3 + $0x168] sm:$0xff] }
  0x2a   : > { %934 = vmatprep.subr.bf16.mxu0 %v933_v5  ;;  %v487_v5 = vld [vmem:[%s1597_s3 + $0x150] sm:$0xff]  ;;  %v983_v6 = vpack.c.bf16 %v456_v4, %v455_v3  ;;  %v476_v21 = vld [vmem:[%s1597_s3 + $0xf8] sm:$0xff]  ;;  %v724_v43 = vld [vmem:[%s1598_s4] ss:$0 sm:$0xff] }
  0x2b   : > { %957 = vmatpush3.bf16.msra.mxu1 %v956_v9  ;;  %v1009_v9 = vpack.c.bf16 %v488_v8, %v487_v5  ;;  %v460_v24 = vld [vmem:[%s1597_s3 + $0x78] sm:$0xff]  ;;  %v491_v25 = vld [vmem:[%s1597_s3 + $0x170] sm:$0xff] }
  0x2c   : > { %958 = vmatprep.subr.bf16.mxu1 %v1123_v7 }
  0x2d   : > { %936 = vmatpush3.bf16.msra.mxu0 %v935_v15  ;;  %v458_v15 = vld [vmem:[%s1597_s3 + $0x68] sm:$0xff] }
  0x2e   : > { %962 = vmatprep.subr.bf16.mxu0 %v961_v17  ;;  %v987_v16 = vpack.c.bf16 %v458_v15, %v457_v14  ;;  %v489_v17 = vld [vmem:[%s1597_s3 + $0x160] sm:$0xff] }
  0x2f   : > { %960 = vmatpush3.bf16.msra.mxu1 %v959_v20  ;;  %v1012_v19 = vpack.c.bf16 %v490_v18, %v489_v17  ;;  %v475_v20 = vld [vmem:[%s1597_s3 + $0xf0] sm:$0xff] }
  0x30   : > { %722 = vmatmul.mubr.msk.f32.vlgmr.msra.gmra.mrb[0].mxu0 %vm1394_vm1, %v237_v23  ;;  %993 = vmatprep.subr.bf16.mxu1 %v1123_v7  ;;  %v989_v22 = vpack.c.bf16 %v476_v21, %v475_v20  ;;  %v459_v23 = vld [vmem:[%s1597_s3 + $0x70] sm:$0xff] }
  0x31   : > { %964 = vmatpush3.bf16.msra.mxu0 %v963_v27  ;;  %v991_v27 = vpack.c.bf16 %v460_v24, %v459_v23 }
  0x32   : > { %868 = vmatmul.mubr.msk.f32.vlgmr.msra.gmra.mrb[0].mxu1 %vm1405_vm2, %v241_v28  ;;  %966 = vmatprep.subr.bf16.mxu0 %v965_v29  ;;  %v492_v28 = vld [vmem:[%s1597_s3 + $0x178] sm:$0xff] }
  0x33   : > { %995 = vmatpush3.bf16.msra.mxu1 %v994_v33  ;;  %902 = vmatprep.mubr.msk.f32.mxu1 %vm1124_vm0, %v1125_v13  ;;  %v452_v13 = vld [vmem:[%s1597_s3 + $0x38] sm:$0xff]  ;;  %v1015_v29 = vpack.c.bf16 %v492_v28, %v491_v25  ;;  %v721_v33 = vld [vmem:[%s1596_s2] ss:$0 sm:$0xff] }
  0x34   : > { %996 = vmatprep.subr.bf16.mxu1 %v1123_v7  ;;  %v975_v55 = vpack.c.bf16 %v452_v13, %v451_v49 }
  0x35   : > { %968 = vmatpush3.bf16.msra.mxu0 %v967_v38 }
  0x36   : > { %970 = vmatprep.subr.bf16.mxu0 %v969_v39 }
  0x37   : > { %998 = vmatpush3.bf16.msra.mxu1 %v997_v42 }
  0x38   : > { %999 = vmatprep.subr.bf16.mxu1 %v1123_v7 }
  0x39   : > { %972 = vmatpush3.bf16.msra.mxu0 %v971_v47 }
  0x3a   : > { %974 = vmatprep.subr.bf16.mxu0 %v973_v48 }
  0x3b   : > { %1001 = vmatpush3.bf16.msra.mxu1 %v1000_v50 }
  0x3c   : > { %1002 = vmatprep.subr.bf16.mxu1 %v1123_v7 }
  0x3d   : > { %976 = vmatpush3.bf16.msra.mxu0 %v975_v55 }
  0x3e   : > { %978 = vmatprep.subr.bf16.mxu0 %v977_v56 }
  0x3f   : > { %1004 = vmatpush3.bf16.msra.mxu1 %v1003_v59 }
  0x40   : > { %1005 = vmatprep.subr.bf16.mxu1 %v1123_v7 }
  0x41   : > { %980 = vmatpush3.bf16.msra.mxu0 %v979_v62 }
  0x42   : > { %982 = vmatprep.subr.bf16.mxu0 %v981_v2 }
  0x43   : > { %1007 = vmatpush3.bf16.msra.mxu1 %v1006_v63 }
  0x44   : > { %1008 = vmatprep.subr.bf16.mxu1 %v1123_v7 }
  0x45   : > { %984 = vmatpush3.bf16.msra.mxu0 %v983_v6 }
  0x46   : > { %986 = vmatprep.subr.bf16.mxu0 %v985_v12 }
  0x47   : > { %1010 = vmatpush3.bf16.msra.mxu1 %v1009_v9 }
  0x48   : > { %1011 = vmatprep.subr.bf16.mxu1 %v1123_v7 }
  0x49   : > { %988 = vmatpush3.bf16.msra.mxu0 %v987_v16 }
  0x4a   : > { %990 = vmatprep.subr.bf16.mxu0 %v989_v22 }
  0x4b   : > { %1013 = vmatpush3.bf16.msra.mxu1 %v1012_v19 }
  0x4c   : > { %1014 = vmatprep.subr.bf16.mxu1 %v1123_v7 }
  0x4d   : > { %992 = vmatpush3.bf16.msra.mxu0 %v991_v27 }
  0x4f   : > { %1016 = vmatpush3.bf16.msra.mxu1 %v1015_v29 }
 0x103   : > { %v763_v30 = vpop.f32.mrb[0].mxu0 }
 0x104   : > { %v764_v31 = vpop.f32.mrb[1].mxu0 }
 0x105   : > { %v765_v34 = vadd.f32 %v764_v31, %v763_v30  ;;  %v436_v35 = vpop.f32.mrb[0].mxu1 }
 0x106   : > { %v869_v36 = vpop.f32.mrb[1].mxu1 }
 0x107   : > { %v367_v7 = vadd.f32 %v765_v34, %v721_v33 }
 0x109   : > { %v437_v37 = vadd.f32 %v436_v35, %v367_v7 }
 0x10b   : > { %v440_v38 = vmax.f32 %v437_v37, 0.0 }
 0x10d   : > { %v441_v39 = vrot.slane %v440_v38, 7  ;;  %v443_v40 = vrot.slane %v440_v38, 1  ;;  %564 = vmatprep.mubr.f32.mxu0 %v440_v38 }
 0x10f   : > { %725 = vmatmul.mubr.msk.f32.vlgmr.msra.gmra.mrb[2].mxu0 %vm1394_vm1, %v441_v39  ;;  %903 = vmatmul.mubr.msk.f32.vlgmr.msra.gmra.mrb[2].mxu1 %vm1405_vm2, %v443_v40 }
 0x1e2   : > { %v815_v41 = vpop.f32.mrb[2].mxu0  ;;  %v636_v42 = vpop.f32.mrb[2].mxu1 }
 0x1e3   : > { %v816_v44 = vpop.f32.mrb[3].mxu0  ;;  %v904_v45 = vpop.f32.mrb[3].mxu1 }
 0x1e4   : > { %v817_v46 = vadd.f32 %v816_v44, %v815_v41 }
 0x1e6   : > { %v567_v47 = vadd.f32 %v817_v46, %v724_v43 }
 0x1e8   : > { %v637_v26 = vadd.f32 %v636_v42, %v567_v47 }
 0x1ea   : > { %v640_v48 = vmax.f32 %v637_v26, 0.0 }
 0x1ec   : > { %641 = vst [vmem:[%s215_s17] sm:$0xff] %v640_v48 }
 0x1ed   : > { %1072 = shalt.err (!%p1069_p3)
}
 0x1ee   : > { %s1073_s11 = scalar_lea.hbm %s1552_s7, 128  ;;  %s1077_s14 = scalar_lea.hbm %s1599_s5, 256 }
 0x1ef   : > { %p1074_p4 = scmp.ne.s32.totalorder %s1552_s7, %s1073_s11  ;;  %p1078_p9 = scmp.lt.u32.totalorder %s1552_s7, %s1599_s5 }
 0x1f0   : > { %p1079_p10 = scmp.lt.u32.totalorder %s1077_s14, %s1073_s11  ;;  %p1081_p12 = scmp.lt.u32.totalorder %s1073_s11, %s1552_s7 }
 0x1f1   : > { %p1075_p7 = pnand %p1074_p4, %p1195_p5 }
 0x1f2   : > { %p1080_p11 = por %p1079_p10, %p1078_p9 }
 0x1f3   : > { %p1076_p8 = pneg %p1075_p7 }
 0x1f4   : > { %p1082_p13 = por %p1081_p12, %p1080_p11 }
 0x1f6   : > { %p1083_p0 = pnand %p1082_p13, %p1076_p8 }
 0x1f8   : > { %1086 = shalt.err (!%p1083_p0)
}
 0x1f9   : > { %1017 = dma.vmem_to_hbm [thread:$0]  (%p1195_p5), %s1554_s25, 128, %s1552_s7, %s643_s23  }
 0x1fa PF: > { %p1023_p1 = scmp.ge.s32.totalorder %s1121_s21, 2  ;;  %s668_s13 = sand.u32 1, %s1109_s18  }
 0x1fb   : > { %s669_s17 = scalar_lea.sflag [#allocation3], %s668_s13 }
 0x1fc   : > { %p1020_p2 = pnand %p1023_p1, %p1199_p6 }
 0x1fe   : > { %1104 = dma.done.wait (!%p1020_p2), %s669_s17, 128  }
 0x1ff   : > { %1106 = vsyncadd (!%p1020_p2), %s669_s17, 4294967168  ;;  %p15_p3 = scmp.ge.s32.totalorder %s1182_s24, 4   ;;  %s1606_s18 = smov %s1113_s19 }
 0x200   : > { %s1607_s19 = smov %s1117_s20  ;;  %s1608_s20 = smov %s1193_s27 }
 0x201   : > { %s1609_s21 = smov %s1182_s24  ;;  %17 = sbr.rel (!%p15_p3) target bundleno = 3 (0x3), region = 75 }
 0x208   :  { %674 = vsyncpa [#allocation3], 1 }
 0x209   :  { %676 = vsyncpa [#allocation3 + $0x1], 1 }

</bundles_post_ra>
